<compile_context>
chip_gen: v7x
topology: tpu7x:2x2x1
jax: 0.10.0
libtpu: 0.0.40
codegen_flags: <defaults>
</compile_context>

<pallas_src>
import functools

import jax
import jax.numpy as jnp
from jax.experimental import pallas as pl
from jax.experimental.pallas import tpu as pltpu


def _round_up(v, m):
    return ((v + m - 1) // m) * m


def _vmem_capacity_bytes():
    try:
        return int(pltpu.get_tpu_info().vmem_capacity_bytes)
    except Exception:
        return 64 * 1024 * 1024  # conservative (v7x-sized) fallback


def _focal_loss_kernel(*refs, gamma, use_alpha, n_chunks, inner_steps, rem_last):
    if use_alpha:
        x_ref, t_ref, a_ref, o_ref, acc_ref = refs
    else:
        x_ref, t_ref, o_ref, acc_ref = refs
        a_ref = None

    cid = pl.program_id(0)   # chunk index (outer, "parallel")
    iid = pl.program_id(1)   # tile index within chunk (inner, "arbitrary")

    @pl.when(iid == 0)
    def _():
        acc_ref[...] = jnp.zeros_like(acc_ref)

    x = x_ref[...].astype(jnp.float32)            # (tn, C) logits
    t = t_ref[...]                                 # (tn, 1) int32 targets
    tn, c = x.shape

    # log-softmax pieces; gather z at the target lane first, then subtract the
    # (tn, 1) logsumexp -- no (tn, C) logp materialization.
    m = jnp.max(x, axis=1, keepdims=True)
    z = x - m
    lse = jnp.log(jnp.sum(jnp.exp(z), axis=1, keepdims=True))
    col = jax.lax.broadcasted_iota(jnp.int32, (tn, c), 1)
    z_t = jnp.sum(jnp.where(col == t, z, 0.0), axis=1, keepdims=True)
    logpt = z_t - lse                              # (tn, 1)
    pt = jnp.exp(logpt)                            # before the alpha scale (matches ref)

    if use_alpha:
        logpt = logpt * a_ref[...]                 # per-row alpha gathered in wrapper

    # (1 - pt) ** gamma, specialized at trace time (gamma is a Python float).
    if gamma == 0.0:
        loss = -logpt
    else:
        omp = 1.0 - pt
        if float(gamma).is_integer() and 1 <= int(gamma) <= 8:
            w = omp
            for _ in range(int(gamma) - 1):
                w = w * omp                        # pure VPU multiplies
        else:
            omp = jnp.maximum(omp, 0.0)            # guard tiny negatives under **
            w = omp ** gamma
        loss = -(w * logpt)

    # Accumulate the tile's partial sum into the (1,1) scratch.  Only the single
    # ragged last tile (known at trace time) pays for row masking.
    if rem_last is not None:
        is_last_tile = (cid == n_chunks - 1) & (iid == inner_steps - 1)

        @pl.when(is_last_tile)
        def _():
            row = jax.lax.broadcasted_iota(jnp.int32, (tn, 1), 0)
            masked = jnp.where(row < rem_last, loss, 0.0)   # select, not multiply
            acc_ref[...] += jnp.sum(masked, axis=0, keepdims=True)

        @pl.when(jnp.logical_not(is_last_tile))
        def _():
            acc_ref[...] += jnp.sum(loss, axis=0, keepdims=True)
    else:
        acc_ref[...] += jnp.sum(loss, axis=0, keepdims=True)

    @pl.when(iid == inner_steps - 1)
    def _():
        o_ref[...] = acc_ref[...]


def focal_loss(x, target, gamma=0.0, alpha=None, size_average=True, tile_n=None):
    """Pallas TPU FocalLoss forward.  x: (N, C) float, target: (N,) int."""
    n, c = x.shape
    x_bytes = x.dtype.itemsize
    t2d = target.reshape(n, 1).astype(jnp.int32)

    use_alpha = alpha is not None
    at_rows = None
    if use_alpha:
        if isinstance(alpha, (float, int)):
            alpha_vec = jnp.array([float(alpha), 1.0 - float(alpha)], jnp.float32)
        else:
            alpha_vec = jnp.asarray(alpha, jnp.float32).reshape(-1)
        # Wrapper-side gather: one f32 per row instead of a (1,C) block + C-wide
        # in-kernel select.
        at_rows = alpha_vec[target.astype(jnp.int32)].reshape(n, 1)

    # ---- generation-aware tile sizing --------------------------------------
    cap = _vmem_capacity_bytes()
    vmem_limit = int(min(int(cap * 0.75), 100 * 1024 * 1024))
    tile_budget = int(vmem_limit * 0.7)            # headroom for compiler scratch

    c_pad = _round_up(c, 128)                      # lane padding of logits tile
    bytes_per_row = 2 * c_pad * x_bytes            # double-buffered logits
    bytes_per_row += 2 * 128 * 4                   # (tn,1) int32 targets, lane-padded
    if use_alpha:
        bytes_per_row += 2 * 128 * 4               # (tn,1) f32 per-row alpha

    if tile_n is None:
        tn = tile_budget // max(bytes_per_row, 1)
        tn = max(8, min(tn, 8192))
    else:
        tn = max(8, int(tile_n))
    tn = min(_round_up(tn, 8), _round_up(n, 8))

    total_tiles = pl.cdiv(n, tn)
    # Split into two "parallel" chunks when the work divides evenly (lets v7x's
    # two TensorCores both run; a harmless serial loop on v5e/v6e).
    n_chunks = 2 if (total_tiles >= 4 and total_tiles % 2 == 0) else 1
    inner_steps = total_tiles // n_chunks

    rem = n - (total_tiles - 1) * tn
    rem_last = None if rem == tn else rem          # static; None -> no tail mask

    kernel = functools.partial(
        _focal_loss_kernel,
        gamma=float(gamma),
        use_alpha=use_alpha,
        n_chunks=n_chunks,
        inner_steps=inner_steps,
        rem_last=rem_last,
    )

    row_block = lambda ci, ii: (ci * inner_steps + ii, 0)
    in_specs = [
        pl.BlockSpec((tn, c), row_block),          # logits (native dtype)
        pl.BlockSpec((tn, 1), row_block),          # targets
    ]
    args = [x, t2d]
    if use_alpha:
        in_specs.append(pl.BlockSpec((tn, 1), row_block))
        args.append(at_rows)

    grid_spec = pltpu.PrefetchScalarGridSpec(
        num_scalar_prefetch=0,
        grid=(n_chunks, inner_steps),
        in_specs=in_specs,
        out_specs=pl.BlockSpec((1, 1), lambda ci, ii: (ci, 0)),
        scratch_shapes=[pltpu.VMEM((1, 1), jnp.float32)],
    )

    cost = pl.CostEstimate(
        flops=int(5 * n * c),
        transcendentals=int(n * (c + 2)),
        bytes_accessed=int(n * c * x_bytes + n * 4
                           + (n * 4 if use_alpha else 0) + n_chunks * 4),
    )

    partials = pl.pallas_call(
        kernel,
        grid_spec=grid_spec,
        out_shape=jax.ShapeDtypeStruct((n_chunks, 1), jnp.float32),
        compiler_params=pltpu.CompilerParams(
            dimension_semantics=("parallel", "arbitrary"),
            vmem_limit_bytes=vmem_limit),
        cost_estimate=cost,
    )(*args)

    total = jnp.sum(partials)
    if size_average:
        total = total / jnp.float32(n)
    return total


def _focal_loss_ref(x, target, gamma, alpha, size_average):
    logp = jax.nn.log_softmax(x.astype(jnp.float32), axis=1)
    logpt = jnp.take_along_axis(logp, target.reshape(-1, 1), axis=1).reshape(-1)
    pt = jnp.exp(logpt)
    if alpha is not None:
        if isinstance(alpha, (float, int)):
            alpha = [float(alpha), 1.0 - float(alpha)]
        at = jnp.asarray(alpha, jnp.float32)[target]
        logpt = logpt * at
    loss = -1.0 * (1.0 - pt) ** gamma * logpt
    return loss.mean() if size_average else loss.sum()


if __name__ == "__main__":
    key = jax.random.PRNGKey(0)
    k1, k2, k3, k4 = jax.random.split(key, 4)

    # Case 1: gamma=2, per-class alpha, mean reduction, auto tile sizing.
    N, C = 64, 8
    alpha = [0.25, 0.75, 0.5, 0.5, 0.1, 0.9, 0.3, 0.7]
    x = jax.random.normal(k1, (N, C), dtype=jnp.float32)
    target = jax.random.randint(k2, (N,), 0, C, dtype=jnp.int32)
    out = jax.block_until_ready(focal_loss(x, target, gamma=2.0, alpha=alpha,
                                           size_average=True))
    ref = _focal_loss_ref(x, target, 2.0, alpha, True)
    assert jnp.allclose(out, ref, rtol=1e-5, atol=1e-5), (out, ref)

    # Case 2: gamma=0, no alpha, sum reduction, N not a multiple of the tile
    # (ragged last tile) and bf16 logits; 4 tiles -> exercises the 2-chunk path.
    N2, C2 = 100, 16
    x2 = jax.random.normal(k3, (N2, C2), dtype=jnp.float32).astype(jnp.bfloat16)
    target2 = jax.random.randint(k4, (N2,), 0, C2, dtype=jnp.int32)
    out2 = jax.block_until_ready(focal_loss(x2, target2, gamma=0.0, alpha=None,
                                            size_average=False, tile_n=32))
    ref2 = _focal_loss_ref(x2, target2, 0.0, None, False)
    assert jnp.allclose(out2, ref2, rtol=1e-4, atol=1e-4), (out2, ref2)

    # Case 3: non-integer gamma with mean reduction (clamped (1-pt)**gamma path),
    # 4 aligned tiles across 2 chunks.
    out3 = jax.block_until_ready(focal_loss(x, target, gamma=1.5, alpha=None,
                                            size_average=True, tile_n=16))
    ref3 = _focal_loss_ref(x, target, 1.5, None, True)
    assert jnp.allclose(out3, ref3, rtol=1e-5, atol=1e-5), (out3, ref3)

    print("KERNEL_OK")
</pallas_src>

<mosaic_0001>
module attributes {stable_mosaic.version = 11 : i64} {
  func.func @_focal_loss_kernel(%arg0: i32, %arg1: i32, %arg2: memref<64x8xf32, #tpu.memory_space<vmem>>, %arg3: memref<64x1xi32, #tpu.memory_space<vmem>>, %arg4: memref<64x1xf32, #tpu.memory_space<vmem>>, %arg5: memref<1x1xf32, #tpu.memory_space<vmem>>, %arg6: memref<1x1xf32, #tpu.memory_space<vmem>>) attributes {dimension_semantics = [#tpu.dimension_semantics<parallel>, #tpu.dimension_semantics<arbitrary>], iteration_bounds = array<i64: 1, 1>, scalar_prefetch = 0 : i64, scratch_operands = 1 : i64, tpu.core_type = #tpu.core_type<tc>, window_params = [{transform_indices = @transform_0, window_bounds = array<i64: 64, 8>}, {transform_indices = @transform_1, window_bounds = array<i64: 64, 1>}, {transform_indices = @transform_2, window_bounds = array<i64: 64, 1>}, {transform_indices = @transform_3, window_bounds = array<i64: 1, 1>}]} {
    %c0_i32 = arith.constant 0 : i32
    %0 = arith.cmpi eq, %arg1, %c0_i32 : i32
    %1 = arith.extui %0 : i1 to i32
    %c0_i32_0 = arith.constant 0 : i32
    %2 = arith.cmpi ne, %1, %c0_i32_0 : i32
    scf.if %2 {
      %cst_18 = arith.constant 0.000000e+00 : f32
      %38 = vector.broadcast %cst_18 : f32 to vector<1x1xf32>
      %c0_19 = arith.constant 0 : index
      %c0_20 = arith.constant 0 : index
      %39 = vector.load %arg6[%c0_19, %c0_20] : memref<1x1xf32, #tpu.memory_space<vmem>>, vector<1x1xf32>
      tpu.vector_store %arg6[%c0_19, %c0_20], %38 {strides = array<i32>} : memref<1x1xf32, #tpu.memory_space<vmem>>, vector<1x1xf32>,
    } else {
    }
    %c0 = arith.constant 0 : index
    %c0_1 = arith.constant 0 : index
    %3 = vector.load %arg2[%c0, %c0_1] : memref<64x8xf32, #tpu.memory_space<vmem>>, vector<64x8xf32>
    %c0_2 = arith.constant 0 : index
    %c0_3 = arith.constant 0 : index
    %4 = vector.load %arg3[%c0_2, %c0_3] : memref<64x1xi32, #tpu.memory_space<vmem>>, vector<64x1xi32>
    %cst = arith.constant dense<0xFF800000> : vector<64xf32>
    %5 = vector.multi_reduction <maximumf>, %3, %cst [1] : vector<64x8xf32> to vector<64xf32>
    %6 = vector.shape_cast %5 : vector<64xf32> to vector<64x1xf32>
    %7 = vector.broadcast %6 : vector<64x1xf32> to vector<64x8xf32>
    %8 = arith.subf %3, %7 : vector<64x8xf32>
    %9 = math.exp %8 : vector<64x8xf32>
    %cst_4 = arith.constant dense<0.000000e+00> : vector<64xf32>
    %10 = vector.multi_reduction <add>, %9, %cst_4 [1] : vector<64x8xf32> to vector<64xf32>
    %11 = vector.shape_cast %10 : vector<64xf32> to vector<64x1xf32>
    %12 = math.log %11 : vector<64x1xf32>
    %13 = tpu.iota {dimensions = array<i32: 1>} : vector<64x8xi32>
    %14 = vector.broadcast %4 : vector<64x1xi32> to vector<64x8xi32>
    %15 = arith.cmpi eq, %13, %14 : vector<64x8xi32>
    %cst_5 = arith.constant 0.000000e+00 : f32
    %16 = vector.broadcast %cst_5 : f32 to vector<64x8xf32>
    %17 = arith.select %15, %8, %16 : vector<64x8xi1>, vector<64x8xf32>
    %cst_6 = arith.constant dense<0.000000e+00> : vector<64xf32>
    %18 = vector.multi_reduction <add>, %17, %cst_6 [1] : vector<64x8xf32> to vector<64xf32>
    %19 = vector.shape_cast %18 : vector<64xf32> to vector<64x1xf32>
    %20 = arith.subf %19, %12 : vector<64x1xf32>
    %21 = math.exp %20 : vector<64x1xf32>
    %c0_7 = arith.constant 0 : index
    %c0_8 = arith.constant 0 : index
    %22 = vector.load %arg4[%c0_7, %c0_8] : memref<64x1xf32, #tpu.memory_space<vmem>>, vector<64x1xf32>
    %23 = arith.mulf %20, %22 : vector<64x1xf32>
    %cst_9 = arith.constant 1.000000e+00 : f32
    %24 = vector.broadcast %cst_9 : f32 to vector<64x1xf32>
    %25 = arith.subf %24, %21 : vector<64x1xf32>
    %26 = arith.mulf %25, %25 : vector<64x1xf32>
    %27 = arith.mulf %26, %23 : vector<64x1xf32>
    %cst_10 = arith.constant 0.000000e+00 : f32
    %28 = vector.broadcast %cst_10 : f32 to vector<64x1xf32>
    %29 = arith.subf %28, %27 : vector<64x1xf32>
    %c0_11 = arith.constant 0 : index
    %c0_12 = arith.constant 0 : index
    %30 = vector.load %arg6[%c0_11, %c0_12] : memref<1x1xf32, #tpu.memory_space<vmem>>, vector<1x1xf32>
    %cst_13 = arith.constant dense<0.000000e+00> : vector<1xf32>
    %31 = vector.multi_reduction <add>, %29, %cst_13 [0] : vector<64x1xf32> to vector<1xf32>
    %32 = vector.shape_cast %31 : vector<1xf32> to vector<1x1xf32>
    %33 = arith.addf %30, %32 : vector<1x1xf32>
    %c0_14 = arith.constant 0 : index
    %c0_15 = arith.constant 0 : index
    %34 = vector.load %arg6[%c0_14, %c0_15] : memref<1x1xf32, #tpu.memory_space<vmem>>, vector<1x1xf32>
    tpu.vector_store %arg6[%c0_14, %c0_15], %33 {strides = array<i32>} : memref<1x1xf32, #tpu.memory_space<vmem>>, vector<1x1xf32>,
    %c0_i32_16 = arith.constant 0 : i32
    %35 = arith.cmpi eq, %arg1, %c0_i32_16 : i32
    %36 = arith.extui %35 : i1 to i32
    %c0_i32_17 = arith.constant 0 : i32
    %37 = arith.cmpi ne, %36, %c0_i32_17 : i32
    scf.if %37 {
      %c0_18 = arith.constant 0 : index
      %c0_19 = arith.constant 0 : index
      %38 = vector.load %arg6[%c0_18, %c0_19] : memref<1x1xf32, #tpu.memory_space<vmem>>, vector<1x1xf32>
      %c0_20 = arith.constant 0 : index
      %c0_21 = arith.constant 0 : index
      %39 = vector.load %arg5[%c0_20, %c0_21] : memref<1x1xf32, #tpu.memory_space<vmem>>, vector<1x1xf32>
      tpu.vector_store %arg5[%c0_20, %c0_21], %38 {strides = array<i32>} : memref<1x1xf32, #tpu.memory_space<vmem>>, vector<1x1xf32>,
    } else {
    }
    return
  }
  func.func @transform_0(%arg0: i32, %arg1: i32) -> (i32, i32) {
    %c1_i32 = arith.constant 1 : i32
    %0 = arith.muli %arg0, %c1_i32 : i32
    %1 = arith.addi %0, %arg1 : i32
    %c0_i32 = arith.constant 0 : i32
    %c0_i32_0 = arith.constant 0 : i32
    return %1, %c0_i32 : i32, i32
  }
  func.func @transform_1(%arg0: i32, %arg1: i32) -> (i32, i32) {
    %c1_i32 = arith.constant 1 : i32
    %0 = arith.muli %arg0, %c1_i32 : i32
    %1 = arith.addi %0, %arg1 : i32
    %c0_i32 = arith.constant 0 : i32
    %c0_i32_0 = arith.constant 0 : i32
    return %1, %c0_i32 : i32, i32
  }
  func.func @transform_2(%arg0: i32, %arg1: i32) -> (i32, i32) {
    %c1_i32 = arith.constant 1 : i32
    %0 = arith.muli %arg0, %c1_i32 : i32
    %1 = arith.addi %0, %arg1 : i32
    %c0_i32 = arith.constant 0 : i32
    %c0_i32_0 = arith.constant 0 : i32
    return %1, %c0_i32 : i32, i32
  }
  func.func @transform_3(%arg0: i32, %arg1: i32) -> (i32, i32) {
    %c0_i32 = arith.constant 0 : i32
    %c0_i32_0 = arith.constant 0 : i32
    return %arg0, %c0_i32 : i32, i32
  }
}

</mosaic_0001>

<bundles_post_ra>
// kernel: tpu_custom_call.1
= control target key start
LH: loop header
LB: loop body
LE: loop exit
PB: predicated region body
PF: predicated region fallthrough
CT: control target
= control target key end

     0   :  { %vm103_vm0 = vcmask 64512   ;;  %v470_v6 = vmov 0   ;;  %s644_s0 = inlined_call_operand.vmem [shape: f32[64,8], index: 0, kind: input, shape index: {}]   ;;  %s645_s1 = inlined_call_operand.vmem [shape: s32[64,1], index: 1, kind: input, shape index: {}]   ;;  %s646_s2 = inlined_call_operand.vmem [shape: f32[64,1], index: 2, kind: input, shape index: {}]   ;;  %s647_s3 = inlined_call_operand.hbm [shape: f32[1,1], index: 3, kind: output, shape index: {}]  }
   0x1   :  { %v89_v0 = vld [vmem:[%s644_s0 + $0x10] sm:$0xff]  ;;  %v87_v1 = vld [vmem:[%s644_s0] sm:$0xff]  ;;  %v90_v2 = vld [vmem:[%s644_s0 + $0x18] sm:$0xff]  ;;  %397 = vset.pattern.permute.xlu1 %v470_v6  ;;  %396 = vset.pattern.permute.xlu0 %v470_v6 }
   0x2   :  { %v110_v3 = vsel %vm103_vm0, %v89_v0, -inf  ;;  %v104_v4 = vsel %vm103_vm0, %v87_v1, -inf  ;;  %v88_v5 = vld [vmem:[%s644_s0 + $0x8] sm:$0xff]  ;;  %v113_v7 = vsel %vm103_vm0, %v90_v2, -inf  ;;  %v91_v10 = vld [vmem:[%s644_s0 + $0x20] sm:$0xff] }
   0x3   :  { %111 = vmax.xlane.f32.xlu1 %v110_v3  ;;  %105 = vmax.xlane.f32.xlu0 %v104_v4  ;;  %v107_v8 = vsel %vm103_vm0, %v88_v5, -inf  ;;  %v92_v9 = vld [vmem:[%s644_s0 + $0x28] sm:$0xff] }
   0x4   :  { %8 = vsyncpa [#allocation4], 0  ;;  %v119_v11 = vsel %vm103_vm0, %v92_v9, -inf  ;;  %v116_v12 = vsel %vm103_vm0, %v91_v10, -inf  ;;  %v94_v13 = vld [vmem:[%s644_s0 + $0x38] sm:$0xff]  ;;  %v93_v14 = vld [vmem:[%s644_s0 + $0x30] sm:$0xff]  ;;  %v192_v53 = vlaneseq }
   0x5   :  { %v125_v15 = vsel %vm103_vm0, %v94_v13, -inf  ;;  %v122_v16 = vsel %vm103_vm0, %v93_v14, -inf  ;;  %v96_v17 = vld [vmem:[%s645_s1 + $0x8] sm:$0xff]  ;;  %v97_v18 = vld [vmem:[%s645_s1 + $0x10] sm:$0xff]  ;;  %v95_v19 = vld [vmem:[%s645_s1] sm:$0xff]  ;;  %vm85_vm9 = vcmask 0  }
   0x6   :  { %v98_v20 = vld [vmem:[%s645_s1 + $0x18] sm:$0xff]  ;;  %v99_v21 = vld [vmem:[%s645_s1 + $0x20] sm:$0xff]  ;;  %v100_v22 = vld [vmem:[%s645_s1 + $0x28] sm:$0xff]  ;;  %v193_v60 = vand.u32 127, %v192_v53  ;;  %vm331_vm10 = vcmask 7168  }
   0x7   :  { %114 = vmax.xlane.f32.xlu1 %v113_v7  ;;  %108 = vmax.xlane.f32.xlu0 %v107_v8  ;;  %v101_v23 = vld [vmem:[%s645_s1 + $0x30] sm:$0xff]  ;;  %v102_v24 = vld [vmem:[%s645_s1 + $0x38] sm:$0xff] }
   0xb   :  { %120 = vmax.xlane.f32.xlu1 %v119_v11  ;;  %117 = vmax.xlane.f32.xlu0 %v116_v12 }
   0xf   :  { %126 = vmax.xlane.f32.xlu1 %v125_v15  ;;  %123 = vmax.xlane.f32.xlu0 %v122_v16 }
  0x20   :  { %198 = vperm.xlu1 %397, %v96_v17  }
  0x24   :  { %201 = vperm.xlu1 %397, %v97_v18  }
  0x25   :  { %195 = vperm.xlu0 %396, %v95_v19  }
  0x28   :  { %204 = vperm.xlu1 %397, %v98_v20  }
  0x2c   :  { %207 = vperm.xlu1 %397, %v99_v21  }
  0x30   :  { %210 = vperm.xlu1 %397, %v100_v22  }
  0x34   :  { %213 = vperm.xlu1 %397, %v101_v23  }
  0x38   :  { %216 = vperm.xlu1 %397, %v102_v24  }
  0x90   :  { %v112_v25 = vpop.xlane.xlu1 %111  ;;  %v106_v26 = vpop.xlane.xlu0 %105 }
  0x91   :  { %v549_v27 = vsub.f32 %v87_v1, %v106_v26  ;;  %v552_v29 = vsub.f32 %v89_v0, %v112_v25 }
  0x93   :  { %v136_v28 = vmul.f32 1.442695, %v549_v27  ;;  %v140_v36 = vmul.f32 1.442695, %v552_v29 }
  0x94   :  { %v115_v30 = vpop.xlane.xlu1 %114  ;;  %v109_v31 = vpop.xlane.xlu0 %108 }
  0x95   :  { %v554_v32 = vsub.f32 %v90_v2, %v115_v30  ;;  %v129_v33 = vsub.f32 %v88_v5, %v109_v31  ;;  %398 = vpow2.f32 %v136_v28 }
  0x97   :  { %v142_v34 = vmul.f32 1.442695, %v554_v32  ;;  %v138_v35 = vmul.f32 1.442695, %v129_v33 }
  0x98   :  { %v121_v37 = vpop.xlane.xlu1 %120  ;;  %v118_v38 = vpop.xlane.xlu0 %117 }
  0x99   :  { %400 = vpow2.f32 %v142_v34  ;;  %v558_v39 = vsub.f32 %v92_v9, %v121_v37  ;;  %v560_v40 = vsub.f32 %v91_v10, %v118_v38 }
  0x9a   :  { %402 = vpow2.f32 %v138_v35 }
  0x9b   :  { %v146_v41 = vmul.f32 1.442695, %v558_v39  ;;  %v144_v42 = vmul.f32 1.442695, %v560_v40  ;;  %404 = vpow2.f32 %v140_v36 }
  0x9c   :  { %v127_v43 = vpop.xlane.xlu1 %126  ;;  %v124_v44 = vpop.xlane.xlu0 %123 }
  0x9d   :  { %406 = vpow2.f32 %v146_v41  ;;  %v564_v45 = vsub.f32 %v94_v13, %v127_v43  ;;  %v566_v46 = vsub.f32 %v93_v14, %v124_v44 }
  0x9e   :  { %408 = vpow2.f32 %v144_v42 }
  0x9f   :  { %v150_v47 = vmul.f32 1.442695, %v564_v45  ;;  %v148_v48 = vmul.f32 1.442695, %v566_v46  ;;  %v399_v49 = vpop.eup %398 }
  0xa0   :  { %v199_v50 = vpop.permute.xlu1 %198  ;;  %v152_v51 = vsel %vm103_vm0, %v399_v49, 0.0 }
  0xa1   :  { %410 = vpow2.f32 %v150_v47  ;;  %153 = vadd.xlane.f32.xlu1 %v152_v51  ;;  %vm219_vm1 = vcmp.eq.s32.totalorder %v193_v60, %v199_v50 }
  0xa2   :  { %412 = vpow2.f32 %v148_v48  ;;  %v227_v7 = vsel %vm219_vm1, %v129_v33, 0.0 }
  0xa3   :  { %v401_v52 = vpop.eup %400  ;;  %v237_v10 = vsel %vm103_vm0, %v227_v7, 0.0 }
  0xa4   :  { %v403_v54 = vpop.eup %402  ;;  %v202_v55 = vpop.permute.xlu1 %201  ;;  %v161_v56 = vsel %vm103_vm0, %v401_v52, 0.0 }
  0xa5   :  { %v155_v57 = vsel %vm103_vm0, %v403_v54, 0.0  ;;  %v405_v58 = vpop.eup %404  ;;  %162 = vadd.xlane.f32.xlu1 %v161_v56  ;;  %v196_v4 = vpop.permute.xlu0 %195  ;;  %vm220_vm4 = vcmp.eq.s32.totalorder %v193_v60, %v202_v55 }
  0xa6   :  { %156 = vadd.xlane.f32.xlu0 %v155_v57  ;;  %v158_v0 = vsel %vm103_vm0, %v405_v58, 0.0  ;;  %vm218_vm2 = vcmp.eq.s32.totalorder %v193_v60, %v196_v4  ;;  %v228_v17 = vsel %vm220_vm4, %v552_v29, 0.0 }
  0xa7   :  { %v407_v59 = vpop.eup %406  ;;  %v226_v12 = vsel %vm218_vm2, %v549_v27, 0.0  ;;  %v240_v20 = vsel %vm103_vm0, %v228_v17, 0.0  ;;  %v471_v27 = vmov 0.0  }
  0xa8   :  { %v409_v61 = vpop.eup %408  ;;  %v205_v62 = vpop.permute.xlu1 %204  ;;  %v167_v63 = vsel %vm103_vm0, %v407_v59, 0.0  ;;  %v234_v15 = vsel %vm103_vm0, %v226_v12, 0.0  ;;  %86 = vst.msk [vmem:[#allocation2] sm:$0x1] %vm85_vm9, %v471_v27 }
  0xa9   :  { %168 = vadd.xlane.f32.xlu1 %v167_v63  ;;  %v164_v2 = vsel %vm103_vm0, %v409_v61, 0.0  ;;  %vm221_vm3 = vcmp.eq.s32.totalorder %v193_v60, %v205_v62 }
  0xaa   :  { %159 = vadd.xlane.f32.xlu0 %v158_v0  ;;  %v229_v11 = vsel %vm221_vm3, %v554_v32, 0.0 }
  0xab   :  { %v411_v1 = vpop.eup %410  ;;  %v243_v14 = vsel %vm103_vm0, %v229_v11, 0.0  ;;  %v283_v11 = vld [vmem:[%s646_s2 + $0x8] sm:$0xff] }
  0xac   :  { %v413_v3 = vpop.eup %412  ;;  %v208_v5 = vpop.permute.xlu1 %207  ;;  %v173_v6 = vsel %vm103_vm0, %v411_v1, 0.0 }
  0xad   :  { %174 = vadd.xlane.f32.xlu1 %v173_v6  ;;  %v170_v8 = vsel %vm103_vm0, %v413_v3, 0.0  ;;  %vm222_vm6 = vcmp.eq.s32.totalorder %v193_v60, %v208_v5 }
  0xae   :  { %165 = vadd.xlane.f32.xlu0 %v164_v2  ;;  %v230_v22 = vsel %vm222_vm6, %v560_v40, 0.0 }
  0xaf   :  { %v246_v24 = vsel %vm103_vm0, %v230_v22, 0.0 }
  0xb0   :  { %v211_v9 = vpop.permute.xlu1 %210 }
  0xb1   :  { %238 = vadd.xlane.f32.xlu1 %v237_v10  ;;  %vm223_vm5 = vcmp.eq.s32.totalorder %v193_v60, %v211_v9 }
  0xb2   :  { %171 = vadd.xlane.f32.xlu0 %v170_v8  ;;  %v231_v16 = vsel %vm223_vm5, %v558_v39, 0.0 }
  0xb3   :  { %v249_v19 = vsel %vm103_vm0, %v231_v16, 0.0 }
  0xb4   :  { %v214_v13 = vpop.permute.xlu1 %213 }
  0xb5   :  { %244 = vadd.xlane.f32.xlu1 %v243_v14  ;;  %vm224_vm8 = vcmp.eq.s32.totalorder %v193_v60, %v214_v13 }
  0xb6   :  { %235 = vadd.xlane.f32.xlu0 %v234_v15  ;;  %v232_v25 = vsel %vm224_vm8, %v566_v46, 0.0 }
  0xb7   :  { %v252_v26 = vsel %vm103_vm0, %v232_v25, 0.0 }
  0xb8   :  { %v217_v18 = vpop.permute.xlu1 %216 }
  0xb9   :  { %vm225_vm7 = vcmp.eq.s32.totalorder %v193_v60, %v217_v18  ;;  %250 = vadd.xlane.f32.xlu1 %v249_v19 }
  0xba   :  { %241 = vadd.xlane.f32.xlu0 %v240_v20  ;;  %v233_v21 = vsel %vm225_vm7, %v564_v45, 0.0  ;;  %v282_v20 = vld [vmem:[%s646_s2] sm:$0xff] }
  0xbb   :  { %v255_v23 = vsel %vm103_vm0, %v233_v21, 0.0  ;;  %v285_v21 = vld [vmem:[%s646_s2 + $0x18] sm:$0xff] }
  0xbd   :  { %256 = vadd.xlane.f32.xlu1 %v255_v23 }
  0xbe   :  { %247 = vadd.xlane.f32.xlu0 %v246_v24 }
  0xc2   :  { %253 = vadd.xlane.f32.xlu0 %v252_v26 }
 0x12e   :  { %v154_v28 = vpop.xlane.xlu1 %153 }
 0x12f   :  { %414 = vlog2.f32 %v154_v28 }
 0x132   :  { %v163_v29 = vpop.xlane.xlu1 %162 }
 0x133   :  { %v157_v30 = vpop.xlane.xlu0 %156  ;;  %416 = vlog2.f32 %v163_v29 }
 0x134   :  { %418 = vlog2.f32 %v157_v30 }
 0x136   :  { %v169_v31 = vpop.xlane.xlu1 %168 }
 0x137   :  { %v160_v32 = vpop.xlane.xlu0 %159  ;;  %420 = vlog2.f32 %v169_v31  ;;  %v284_v31 = vld [vmem:[%s646_s2 + $0x10] sm:$0xff] }
 0x138   :  { %422 = vlog2.f32 %v160_v32 }
 0x139   :  { %v415_v35 = vpop.eup %414 }
 0x13a   :  { %v175_v33 = vpop.xlane.xlu1 %174  ;;  %v177_v44 = vmul.f32 0.6931472, %v415_v35 }
 0x13b   :  { %v166_v34 = vpop.xlane.xlu0 %165  ;;  %424 = vlog2.f32 %v175_v33 }
 0x13c   :  { %426 = vlog2.f32 %v166_v34 }
 0x13d   :  { %v417_v36 = vpop.eup %416 }
 0x13e   :  { %v419_v37 = vpop.eup %418  ;;  %v239_v38 = vpop.xlane.xlu1 %238  ;;  %v183_v41 = vmul.f32 0.6931472, %v417_v36  ;;  %v287_v36 = vld [vmem:[%s646_s2 + $0x28] sm:$0xff] }
 0x13f   :  { %v172_v39 = vpop.xlane.xlu0 %171  ;;  %v179_v40 = vmul.f32 0.6931472, %v419_v37 }
 0x140   :  { %428 = vlog2.f32 %v172_v39 }
 0x141   :  { %v421_v42 = vpop.eup %420  ;;  %v259_v43 = vsub.f32 %v239_v38, %v179_v40 }
 0x142   :  { %v423_v45 = vpop.eup %422  ;;  %v245_v46 = vpop.xlane.xlu1 %244  ;;  %v187_v51 = vmul.f32 0.6931472, %v421_v42  ;;  %v286_v42 = vld [vmem:[%s646_s2 + $0x20] sm:$0xff] }
 0x143   :  { %v236_v47 = vpop.xlane.xlu0 %235  ;;  %v268_v48 = vmul.f32 1.442695, %v259_v43  ;;  %v261_v49 = vsub.f32 %v245_v46, %v183_v41  ;;  %v181_v55 = vmul.f32 0.6931472, %v423_v45  ;;  %v291_v17 = vmul.f32 %v283_v11, %v259_v43 }
 0x144   :  { %v258_v50 = vsub.f32 %v236_v47, %v177_v44 }
 0x145   :  { %v425_v52 = vpop.eup %424  ;;  %430 = vpow2.f32 %v268_v48  ;;  %v272_v53 = vmul.f32 1.442695, %v261_v49  ;;  %v293_v29 = vmul.f32 %v285_v21, %v261_v49 }
 0x146   :  { %v266_v54 = vmul.f32 1.442695, %v258_v50  ;;  %v427_v56 = vpop.eup %426  ;;  %v251_v57 = vpop.xlane.xlu1 %250  ;;  %v191_v61 = vmul.f32 0.6931472, %v425_v52  ;;  %v290_v26 = vmul.f32 %v282_v20, %v258_v50 }
 0x147   :  { %v242_v58 = vpop.xlane.xlu0 %241  ;;  %432 = vpow2.f32 %v272_v53  ;;  %v263_v59 = vsub.f32 %v251_v57, %v187_v51  ;;  %v185_v0 = vmul.f32 0.6931472, %v427_v56  ;;  %v289_v51 = vld [vmem:[%s646_s2 + $0x38] sm:$0xff] }
 0x148   :  { %v260_v60 = vsub.f32 %v242_v58, %v181_v55  ;;  %434 = vpow2.f32 %v266_v54  ;;  %v288_v58 = vld [vmem:[%s646_s2 + $0x30] sm:$0xff]  ;;  %s472_s2 = smov [#allocation3]  }
 0x149   :  { %v276_v62 = vmul.f32 1.442695, %v263_v59  ;;  %v295_v46 = vmul.f32 %v287_v36, %v263_v59  ;;  %s367_s4 = sshll.u32 %s472_s2, 4  ;;  %s368_s4 = int_to_ptr.vmem [resolvable:$true] %s367_s4 }
 0x14a   :  { %v270_v63 = vmul.f32 1.442695, %v260_v60  ;;  %v429_v1 = vpop.eup %428  ;;  %v257_v2 = vpop.xlane.xlu1 %256  ;;  %v292_v40 = vmul.f32 %v284_v31, %v260_v60  ;;  %s446_s5 = scalar_lea.vmem %s368_s4, 16  ;;  %s450_s6 = scalar_lea.vmem %s368_s4, 32 }
 0x14b   :  { %v248_v3 = vpop.xlane.xlu0 %247  ;;  %436 = vpow2.f32 %v276_v62  ;;  %v594_v4 = vsub.f32 %v257_v2, %v191_v61  ;;  %v189_v8 = vmul.f32 0.6931472, %v429_v1  ;;  %p447_p0 = scmp.ne.s32.totalorder %s368_s4, %s446_s5  ;;  %p451_p1 = scmp.lt.s32.totalorder %s368_s4, %s368_s4 }
 0x14c   :  { %v262_v5 = vsub.f32 %v248_v3, %v185_v0  ;;  %438 = vpow2.f32 %v270_v63  ;;  %p452_p2 = scmp.lt.s32.totalorder %s450_s6, %s446_s5 }
 0x14d   :  { %v280_v6 = vmul.f32 1.442695, %v594_v4  ;;  %v297_v62 = vmul.f32 %v289_v51, %v594_v4 }
 0x14e   :  { %v274_v7 = vmul.f32 1.442695, %v262_v5  ;;  %v294_v52 = vmul.f32 %v286_v42, %v262_v5  ;;  %p453_p3 = por %p452_p2, %p451_p1 }
 0x14f   :  { %v254_v9 = vpop.xlane.xlu0 %253  ;;  %v431_v10 = vpop.eup %430  ;;  %440 = vpow2.f32 %v280_v6 }
 0x150   :  { %v264_v12 = vsub.f32 %v254_v9, %v189_v8  ;;  %v299_v13 = vsub.f32 1.0, %v431_v10  ;;  %442 = vpow2.f32 %v274_v7  ;;  %p454_p4 = pnand %p453_p3, %p447_p0 }
 0x151   :  { %v433_v14 = vpop.eup %432 }
 0x152   :  { %v278_v15 = vmul.f32 1.442695, %v264_v12  ;;  %v435_v16 = vpop.eup %434  ;;  %v307_v18 = vmul.f32 %v299_v13, %v299_v13  ;;  %v301_v19 = vsub.f32 1.0, %v433_v14  ;;  %v296_v1 = vmul.f32 %v288_v58, %v264_v12 }
 0x153   :  { %v298_v22 = vsub.f32 1.0, %v435_v16 }
 0x154   :  { %444 = vpow2.f32 %v278_v15  ;;  %v315_v23 = vmul.f32 %v307_v18, %v291_v17  ;;  %v309_v24 = vmul.f32 %v301_v19, %v301_v19 }
 0x155   :  { %v437_v25 = vpop.eup %436  ;;  %v306_v27 = vmul.f32 %v298_v22, %v298_v22 }
 0x156   :  { %v439_v28 = vpop.eup %438  ;;  %v303_v30 = vsub.f32 1.0, %v437_v25  ;;  %v323_v34 = vsub.f32 0.0, %v315_v23  ;;  %v317_v35 = vmul.f32 %v309_v24, %v293_v29  ;;  %v330_v24 = vld [vmem:[#allocation2] sm:$0x1] }
 0x157   :  { %v314_v32 = vmul.f32 %v306_v27, %v290_v26  ;;  %v300_v33 = vsub.f32 1.0, %v439_v28 }
 0x158   :  { %v311_v39 = vmul.f32 %v303_v30, %v303_v30  ;;  %v333_v49 = vsel %vm331_vm10, %v323_v34, 0.0  ;;  %v325_v50 = vsub.f32 0.0, %v317_v35 }
 0x159   :  { %v441_v37 = vpop.eup %440  ;;  %v322_v38 = vsub.f32 0.0, %v314_v32  ;;  %v308_v41 = vmul.f32 %v300_v33, %v300_v33 }
 0x15a   :  { %v443_v43 = vpop.eup %442  ;;  %v305_v44 = vsub.f32 1.0, %v441_v37  ;;  %v319_v54 = vmul.f32 %v311_v39, %v295_v46  ;;  %v337_v3 = vsel %vm331_vm10, %v325_v50, 0.0 }
 0x15b   :  { %v332_v45 = vsel %vm331_vm10, %v322_v38, 0.0  ;;  %v316_v47 = vmul.f32 %v308_v41, %v292_v40  ;;  %v302_v48 = vsub.f32 1.0, %v443_v43 }
 0x15c   :  { %v313_v56 = vmul.f32 %v305_v44, %v305_v44  ;;  %v334_v59 = vadd.f32 %v333_v49, %v332_v45  ;;  %v327_v5 = vsub.f32 0.0, %v319_v54 }
 0x15d   :  { %v324_v55 = vsub.f32 0.0, %v316_v47  ;;  %v310_v57 = vmul.f32 %v302_v48, %v302_v48 }
 0x15e   :  { %v445_v53 = vpop.eup %444  ;;  %v321_v6 = vmul.f32 %v313_v56, %v297_v62  ;;  %v341_v14 = vsel %vm331_vm10, %v327_v5, 0.0 }
 0x15f   :  { %v304_v60 = vsub.f32 1.0, %v445_v53  ;;  %v335_v61 = vsel %vm331_vm10, %v324_v55, 0.0  ;;  %v318_v63 = vmul.f32 %v310_v57, %v294_v52 }
 0x160   :  { %v336_v0 = vadd.f32 %v335_v61, %v334_v59  ;;  %v329_v15 = vsub.f32 0.0, %v321_v6 }
 0x161   :  { %v312_v2 = vmul.f32 %v304_v60, %v304_v60  ;;  %v326_v7 = vsub.f32 0.0, %v318_v63 }
 0x162   :  { %v338_v8 = vadd.f32 %v337_v3, %v336_v0  ;;  %v345_v12 = vsel %vm331_vm10, %v329_v15, 0.0 }
 0x163   :  { %v320_v9 = vmul.f32 %v312_v2, %v296_v1  ;;  %v339_v10 = vsel %vm331_vm10, %v326_v7, 0.0 }
 0x164   :  { %v340_v11 = vadd.f32 %v339_v10, %v338_v8 }
 0x165   :  { %v328_v13 = vsub.f32 0.0, %v320_v9 }
 0x166   :  { %v342_v16 = vadd.f32 %v341_v14, %v340_v11 }
 0x167   :  { %v343_v4 = vsel %vm331_vm10, %v328_v13, 0.0 }
 0x168   :  { %v344_v17 = vadd.f32 %v343_v4, %v342_v16 }
 0x16a   :  { %v346_v18 = vadd.f32 %v345_v12, %v344_v17 }
 0x16c   :  { %v347_v19 = vrot.slane %v346_v18, 4 }
 0x16e   :  { %v348_v20 = vadd.f32 %v347_v19, %v346_v18 }
 0x170   :  { %v349_v21 = vrot.slane %v348_v20, 2 }
 0x172   :  { %v350_v22 = vadd.f32 %v349_v21, %v348_v20 }
 0x174   :  { %v351_v23 = vrot.slane %v350_v22, 1 }
 0x176   :  { %v352_v25 = vadd.f32 %v351_v23, %v350_v22 }
 0x178   :  { %v353_v26 = vadd.f32 %v352_v25, %v330_v24 }
 0x17a   :  { %355 = vst.msk [vmem:[#allocation2] sm:$0x1] %vm85_vm9, %v353_v26 }
 0x181   :  { %v359_v27 = vld [vmem:[#allocation2] sm:$0x1] }
 0x182   :  { %360 = vst.msk [vmem:[#allocation3] sm:$0x1] %vm85_vm9, %v359_v27 }
 0x183   :  { %457 = shalt.err (!%p454_p4)
}
 0x184   :  { %s458_s8 = scalar_lea.hbm %s647_s3, 16 }
 0x185   :  { %p459_p5 = scmp.ne.s32.totalorder %s647_s3, %s458_s8  ;;  %p462_p6 = scmp.lt.u32.totalorder %s458_s8, %s647_s3 }
 0x187   :  { %p464_p7 = pnand %p462_p6, %p459_p5 }
 0x189   :  { %467 = shalt.err (!%p464_p7)
}
 0x18a   :  { %370 = dma.vmem_to_hbm [thread:$0]  %s368_s4, 16, %s647_s3, [#allocation4]  }
 0x18b   :  { %468 = dma.done.wait [#allocation4], 16  }
 0x18c   :  { %469 = vsyncadd [#allocation4], 4294967280 }
 0x18d   :  { %374 = vsyncpa [#allocation4], 1 }

</bundles_post_ra>
